<compile_context>
chip_gen: v7x
topology: tpu7x:2x2x1
jax: 0.10.0
libtpu: 0.0.40
codegen_flags: <defaults>
</compile_context>

<pallas_src>
import jax
import jax.numpy as jnp
from jax.experimental import pallas as pl
from jax.experimental.pallas import tpu as pltpu

NOISE_DIM = 100
SEQUENCE_LENGTH = 20
HIDDEN1 = 128
HIDDEN2 = 256

NOISE_PAD = 128   # noise dim zero-padded to a full lane width *inside* VMEM
OUT_PAD = 128     # w3/b3 padded to a full lane width; only 20 cols are stored
MAX_TILE_B = 512  # 512-row tiles already hit ~85% of HBM roofline and give
                  # >=3-4 pipeline steps for large batches on 1-TC chips


def _round_up(x, m):
    return ((x + m - 1) // m) * m


def _generator_kernel(z_ref, w1_ref, b1_ref, w2_ref, b2_ref, w3_ref, b3_ref,
                      out_ref, zpad_ref):
    # Zero-pad the noise dim 100 -> 128 in VMEM (cheap) so the first matmul
    # sees lane-aligned operands, while the HBM stream for z stays at 100 cols.
    zpad_ref[...] = jnp.zeros_like(zpad_ref)
    zpad_ref[:, :NOISE_DIM] = z_ref[...]

    # Layer 1: Linear(100[pad 128] -> 128) + ReLU   (bf16 MXU, f32 accumulate)
    h1 = jnp.dot(zpad_ref[...].astype(jnp.bfloat16), w1_ref[...],
                 preferred_element_type=jnp.float32)
    h1 = jnp.maximum(h1 + b1_ref[...], 0.0)

    # Layer 2: Linear(128 -> 256) + ReLU
    h2 = jnp.dot(h1.astype(jnp.bfloat16), w2_ref[...],
                 preferred_element_type=jnp.float32)
    h2 = jnp.maximum(h2 + b2_ref[...], 0.0)

    # Layer 3: Linear(256 -> 20[w padded to 128]) + Sigmoid.  Only the 20 real
    # columns are sliced and stored (narrow masked store, no 128-wide slab).
    logits = jnp.dot(h2.astype(jnp.bfloat16), w3_ref[...],
                     preferred_element_type=jnp.float32) + b3_ref[...]
    out_ref[...] = jax.nn.sigmoid(
        logits[:, :SEQUENCE_LENGTH]).astype(out_ref.dtype)


def _pick_tile(batch):
    # >=2 grid blocks whenever the batch allows (shards the batch over v7x's
    # two TensorCores), capped at MAX_TILE_B rows for pipeline overlap on the
    # single-TC chips; 8-row floor for sublane alignment.
    return max(8, min(MAX_TILE_B, _round_up(pl.cdiv(batch, 2), 8)))


@jax.jit
def generator_forward(z, params):
    """z: (B, NOISE_DIM) float32. Returns (B, SEQUENCE_LENGTH) float32."""
    w1, b1, w2, b2, w3, b3 = params
    B = z.shape[0]
    tile_b = _pick_tile(B)
    num_blocks = pl.cdiv(B, tile_b)   # ragged last block handled by Pallas

    # Weights & biases resident across grid steps (constant block index).
    resident = lambda a: pl.BlockSpec(a.shape, lambda i: (0, 0))

    flops = 2 * B * (NOISE_PAD * HIDDEN1 + HIDDEN1 * HIDDEN2
                     + HIDDEN2 * OUT_PAD)
    bytes_accessed = (B * NOISE_DIM * 4 + B * SEQUENCE_LENGTH * 4
                      + (w1.size + w2.size + w3.size) * 2
                      + (b1.size + b2.size + b3.size) * 4)
    cost = pl.CostEstimate(flops=flops,
                           transcendentals=B * SEQUENCE_LENGTH,
                           bytes_accessed=bytes_accessed)

    return pl.pallas_call(
        _generator_kernel,
        out_shape=jax.ShapeDtypeStruct((B, SEQUENCE_LENGTH), jnp.float32),
        grid=(num_blocks,),
        in_specs=[pl.BlockSpec((tile_b, NOISE_DIM), lambda i: (i, 0)),
                  resident(w1), resident(b1),
                  resident(w2), resident(b2),
                  resident(w3), resident(b3)],
        out_specs=pl.BlockSpec((tile_b, SEQUENCE_LENGTH), lambda i: (i, 0)),
        scratch_shapes=[pltpu.VMEM((tile_b, NOISE_PAD), jnp.float32)],
        compiler_params=pltpu.CompilerParams(
            dimension_semantics=("parallel",)),
        cost_estimate=cost,
    )(z.astype(jnp.float32), w1, b1, w2, b2, w3, b3)


def init_generator_params(key):
    """PyTorch nn.Linear default init (U[-1/sqrt(fan_in), 1/sqrt(fan_in)]).

    Weights are stored transposed vs PyTorch ((in, out)), zero-padded to
    lane-dense shapes, and cast to bf16 for MXU-native matmuls.  Biases stay
    f32, shape (1, out_padded).
    """
    keys = jax.random.split(key, 6)

    def linear(kw, kb, fan_in, fan_out, pad_in, pad_out):
        bound = 1.0 / jnp.sqrt(float(fan_in))
        w = jax.random.uniform(kw, (fan_in, fan_out), jnp.float32,
                               minval=-bound, maxval=bound)
        b = jax.random.uniform(kb, (1, fan_out), jnp.float32,
                               minval=-bound, maxval=bound)
        w = jnp.pad(w, ((0, pad_in - fan_in), (0, pad_out - fan_out)))
        b = jnp.pad(b, ((0, 0), (0, pad_out - fan_out)))
        return w.astype(jnp.bfloat16), b

    w1, b1 = linear(keys[0], keys[1], NOISE_DIM, HIDDEN1, NOISE_PAD, HIDDEN1)
    w2, b2 = linear(keys[2], keys[3], HIDDEN1, HIDDEN2, HIDDEN1, HIDDEN2)
    w3, b3 = linear(keys[4], keys[5], HIDDEN2, SEQUENCE_LENGTH,
                    HIDDEN2, OUT_PAD)
    return (w1, b1, w2, b2, w3, b3)


def generator_reference(z, params):
    """Pure-JAX reference (f32 math on the de-quantized bf16 weights)."""
    w1, b1, w2, b2, w3, b3 = params
    w1 = w1.astype(jnp.float32)[:NOISE_DIM, :]
    w2 = w2.astype(jnp.float32)
    w3 = w3.astype(jnp.float32)[:, :SEQUENCE_LENGTH]
    b3 = b3[:, :SEQUENCE_LENGTH]
    h1 = jnp.maximum(z @ w1 + b1, 0.0)
    h2 = jnp.maximum(h1 @ w2 + b2, 0.0)
    return jax.nn.sigmoid(h2 @ w3 + b3)


if __name__ == "__main__":
    key = jax.random.PRNGKey(0)
    k_params, k_z1, k_z2 = jax.random.split(key, 3)
    params = init_generator_params(k_params)

    # Small-batch check (single grid block).
    batch = 8
    z = jax.random.normal(k_z1, (batch, NOISE_DIM), jnp.float32)
    out = jax.block_until_ready(generator_forward(z, params))
    ref = generator_reference(z, params)
    assert out.shape == (batch, SEQUENCE_LENGTH), out.shape
    assert jnp.allclose(out, ref, atol=2e-2, rtol=2e-2), "mismatch (B=8)"

    # Multi-block check: exercises >=2 grid blocks + ragged last block.
    batch2 = 300
    z2 = jax.random.normal(k_z2, (batch2, NOISE_DIM), jnp.float32)
    out2 = jax.block_until_ready(generator_forward(z2, params))
    ref2 = generator_reference(z2, params)
    assert out2.shape == (batch2, SEQUENCE_LENGTH), out2.shape
    assert jnp.allclose(out2, ref2, atol=2e-2, rtol=2e-2), "mismatch (B=300)"

    print("KERNEL_OK")
</pallas_src>

<mosaic_0001>
module attributes {stable_mosaic.version = 11 : i64} {
  func.func @_generator_kernel(%arg0: i32, %arg1: memref<8x100xf32, #tpu.memory_space<vmem>>, %arg2: memref<128x128xbf16, #tpu.memory_space<vmem>>, %arg3: memref<1x128xf32, #tpu.memory_space<vmem>>, %arg4: memref<128x256xbf16, #tpu.memory_space<vmem>>, %arg5: memref<1x256xf32, #tpu.memory_space<vmem>>, %arg6: memref<256x128xbf16, #tpu.memory_space<vmem>>, %arg7: memref<1x128xf32, #tpu.memory_space<vmem>>, %arg8: memref<8x20xf32, #tpu.memory_space<vmem>>, %arg9: memref<8x128xf32, #tpu.memory_space<vmem>>) attributes {dimension_semantics = [#tpu.dimension_semantics<parallel>], iteration_bounds = array<i64: 1>, scalar_prefetch = 0 : i64, scratch_operands = 1 : i64, tpu.core_type = #tpu.core_type<tc>, window_params = [{transform_indices = @transform_0, window_bounds = array<i64: 8, 100>}, {pipeline_mode = #tpu.pipeline_mode<synchronous>, transform_indices = @transform_1, window_bounds = array<i64: 128, 128>}, {pipeline_mode = #tpu.pipeline_mode<synchronous>, transform_indices = @transform_2, window_bounds = array<i64: 1, 128>}, {pipeline_mode = #tpu.pipeline_mode<synchronous>, transform_indices = @transform_3, window_bounds = array<i64: 128, 256>}, {pipeline_mode = #tpu.pipeline_mode<synchronous>, transform_indices = @transform_4, window_bounds = array<i64: 1, 256>}, {pipeline_mode = #tpu.pipeline_mode<synchronous>, transform_indices = @transform_5, window_bounds = array<i64: 256, 128>}, {pipeline_mode = #tpu.pipeline_mode<synchronous>, transform_indices = @transform_6, window_bounds = array<i64: 1, 128>}, {transform_indices = @transform_7, window_bounds = array<i64: 8, 20>}]} {
    %cst = arith.constant 0.000000e+00 : f32
    %0 = vector.broadcast %cst : f32 to vector<8x128xf32>
    %c0 = arith.constant 0 : index
    %c0_0 = arith.constant 0 : index
    %1 = vector.load %arg9[%c0, %c0_0] : memref<8x128xf32, #tpu.memory_space<vmem>>, vector<8x128xf32>
    tpu.vector_store %arg9[%c0, %c0_0], %0 {strides = array<i32>} : memref<8x128xf32, #tpu.memory_space<vmem>>, vector<8x128xf32>,
    %c0_1 = arith.constant 0 : index
    %c0_2 = arith.constant 0 : index
    %2 = vector.load %arg1[%c0_1, %c0_2] : memref<8x100xf32, #tpu.memory_space<vmem>>, vector<8x100xf32>
    %c0_3 = arith.constant 0 : index
    %c0_4 = arith.constant 0 : index
    %3 = vector.load %arg9[%c0_3, %c0_4] : memref<8x128xf32, #tpu.memory_space<vmem>>, vector<8x100xf32>
    tpu.vector_store %arg9[%c0_3, %c0_4], %2 {strides = array<i32>} : memref<8x128xf32, #tpu.memory_space<vmem>>, vector<8x100xf32>,
    %c0_5 = arith.constant 0 : index
    %c0_6 = arith.constant 0 : index
    %4 = vector.load %arg9[%c0_5, %c0_6] : memref<8x128xf32, #tpu.memory_space<vmem>>, vector<8x128xf32>
    %5 = arith.truncf %4 : vector<8x128xf32> to vector<8x128xbf16>
    %c0_7 = arith.constant 0 : index
    %c0_8 = arith.constant 0 : index
    %6 = vector.load %arg2[%c0_7, %c0_8] : memref<128x128xbf16, #tpu.memory_space<vmem>>, vector<128x128xbf16>
    %cst_9 = arith.constant dense<0.000000e+00> : vector<8x128xf32>
    %7 = tpu.matmul %5, %6, %cst_9 {dimension_numbers = #tpu.dot_dimension_numbers<[1], [0], [0], [1], [0, 0, 1, 1], [], []>} : vector<8x128xbf16>, vector<128x128xbf16>, vector<8x128xf32> -> vector<8x128xf32>
    %c0_10 = arith.constant 0 : index
    %c0_11 = arith.constant 0 : index
    %8 = vector.load %arg3[%c0_10, %c0_11] : memref<1x128xf32, #tpu.memory_space<vmem>>, vector<1x128xf32>
    %9 = vector.broadcast %8 : vector<1x128xf32> to vector<8x128xf32>
    %10 = arith.addf %7, %9 : vector<8x128xf32>
    %cst_12 = arith.constant 0.000000e+00 : f32
    %11 = vector.broadcast %cst_12 : f32 to vector<8x128xf32>
    %12 = arith.maximumf %10, %11 : vector<8x128xf32>
    %13 = arith.truncf %12 : vector<8x128xf32> to vector<8x128xbf16>
    %c0_13 = arith.constant 0 : index
    %c0_14 = arith.constant 0 : index
    %14 = vector.load %arg4[%c0_13, %c0_14] : memref<128x256xbf16, #tpu.memory_space<vmem>>, vector<128x256xbf16>
    %cst_15 = arith.constant dense<0.000000e+00> : vector<8x256xf32>
    %15 = tpu.matmul %13, %14, %cst_15 {dimension_numbers = #tpu.dot_dimension_numbers<[1], [0], [0], [1], [0, 0, 1, 1], [], []>} : vector<8x128xbf16>, vector<128x256xbf16>, vector<8x256xf32> -> vector<8x256xf32>
    %c0_16 = arith.constant 0 : index
    %c0_17 = arith.constant 0 : index
    %16 = vector.load %arg5[%c0_16, %c0_17] : memref<1x256xf32, #tpu.memory_space<vmem>>, vector<1x256xf32>
    %17 = vector.broadcast %16 : vector<1x256xf32> to vector<8x256xf32>
    %18 = arith.addf %15, %17 : vector<8x256xf32>
    %cst_18 = arith.constant 0.000000e+00 : f32
    %19 = vector.broadcast %cst_18 : f32 to vector<8x256xf32>
    %20 = arith.maximumf %18, %19 : vector<8x256xf32>
    %21 = arith.truncf %20 : vector<8x256xf32> to vector<8x256xbf16>
    %c0_19 = arith.constant 0 : index
    %c0_20 = arith.constant 0 : index
    %22 = vector.load %arg6[%c0_19, %c0_20] : memref<256x128xbf16, #tpu.memory_space<vmem>>, vector<256x128xbf16>
    %cst_21 = arith.constant dense<0.000000e+00> : vector<8x128xf32>
    %23 = tpu.matmul %21, %22, %cst_21 {dimension_numbers = #tpu.dot_dimension_numbers<[1], [0], [0], [1], [0, 0, 1, 1], [], []>} : vector<8x256xbf16>, vector<256x128xbf16>, vector<8x128xf32> -> vector<8x128xf32>
    %c0_22 = arith.constant 0 : index
    %c0_23 = arith.constant 0 : index
    %24 = vector.load %arg7[%c0_22, %c0_23] : memref<1x128xf32, #tpu.memory_space<vmem>>, vector<1x128xf32>
    %25 = vector.broadcast %24 : vector<1x128xf32> to vector<8x128xf32>
    %26 = arith.addf %23, %25 : vector<8x128xf32>
    %27 = vector.extract_strided_slice %26 {offsets = [0, 0], sizes = [8, 20], strides = [1, 1]} : vector<8x128xf32> to vector<8x20xf32>
    %28 = arith.negf %27 : vector<8x20xf32>
    %29 = math.exp %28 : vector<8x20xf32>
    %cst_24 = arith.constant 1.000000e+00 : f32
    %30 = vector.broadcast %cst_24 : f32 to vector<8x20xf32>
    %31 = arith.addf %30, %29 : vector<8x20xf32>
    %32 = arith.divf %30, %31 : vector<8x20xf32>
    %c0_25 = arith.constant 0 : index
    %c0_26 = arith.constant 0 : index
    %33 = vector.load %arg8[%c0_25, %c0_26] : memref<8x20xf32, #tpu.memory_space<vmem>>, vector<8x20xf32>
    tpu.vector_store %arg8[%c0_25, %c0_26], %32 {strides = array<i32>} : memref<8x20xf32, #tpu.memory_space<vmem>>, vector<8x20xf32>,
    return
  }
  func.func @transform_0(%arg0: i32) -> (i32, i32) {
    %c0_i32 = arith.constant 0 : i32
    %c0_i32_0 = arith.constant 0 : i32
    return %arg0, %c0_i32 : i32, i32
  }
  func.func @transform_1(%arg0: i32) -> (i32, i32) {
    %c0_i32 = arith.constant 0 : i32
    %c0_i32_0 = arith.constant 0 : i32
    %c0_i32_1 = arith.constant 0 : i32
    return %c0_i32, %c0_i32_0 : i32, i32
  }
  func.func @transform_2(%arg0: i32) -> (i32, i32) {
    %c0_i32 = arith.constant 0 : i32
    %c0_i32_0 = arith.constant 0 : i32
    %c0_i32_1 = arith.constant 0 : i32
    return %c0_i32, %c0_i32_0 : i32, i32
  }
  func.func @transform_3(%arg0: i32) -> (i32, i32) {
    %c0_i32 = arith.constant 0 : i32
    %c0_i32_0 = arith.constant 0 : i32
    %c0_i32_1 = arith.constant 0 : i32
    return %c0_i32, %c0_i32_0 : i32, i32
  }
  func.func @transform_4(%arg0: i32) -> (i32, i32) {
    %c0_i32 = arith.constant 0 : i32
    %c0_i32_0 = arith.constant 0 : i32
    %c0_i32_1 = arith.constant 0 : i32
    return %c0_i32, %c0_i32_0 : i32, i32
  }
  func.func @transform_5(%arg0: i32) -> (i32, i32) {
    %c0_i32 = arith.constant 0 : i32
    %c0_i32_0 = arith.constant 0 : i32
    %c0_i32_1 = arith.constant 0 : i32
    return %c0_i32, %c0_i32_0 : i32, i32
  }
  func.func @transform_6(%arg0: i32) -> (i32, i32) {
    %c0_i32 = arith.constant 0 : i32
    %c0_i32_0 = arith.constant 0 : i32
    %c0_i32_1 = arith.constant 0 : i32
    return %c0_i32, %c0_i32_0 : i32, i32
  }
  func.func @transform_7(%arg0: i32) -> (i32, i32) {
    %c0_i32 = arith.constant 0 : i32
    %c0_i32_0 = arith.constant 0 : i32
    return %arg0, %c0_i32 : i32, i32
  }
}

</mosaic_0001>

<bundles_post_ra>
// kernel: generator_forward.1
= control target key start
LH: loop header
LB: loop body
LE: loop exit
PB: predicated region body
PF: predicated region fallthrough
CT: control target
= control target key end

     0   :  { %12 = vsyncpa [#allocation4], 0  ;;  %s956_s0 = inlined_call_operand.hbm [shape: f32[8,100], index: 0, kind: input, shape index: {}]   ;;  %s957_s1 = inlined_call_operand.hbm [shape: bf16[128,128], index: 1, kind: input, shape index: {}]   ;;  %s958_s2 = inlined_call_operand.vmem [shape: f32[1,128], index: 2, kind: input, shape index: {}]   ;;  %s959_s3 = inlined_call_operand.hbm [shape: bf16[128,256], index: 3, kind: input, shape index: {}]   ;;  %s960_s4 = inlined_call_operand.vmem [shape: f32[1,256], index: 4, kind: input, shape index: {}]   ;;  %s961_s5 = inlined_call_operand.hbm [shape: bf16[256,128], index: 5, kind: input, shape index: {}]   ;;  %s962_s6 = inlined_call_operand.vmem [shape: f32[1,128], index: 6, kind: input, shape index: {}]   ;;  %s963_s7 = inlined_call_operand.hbm [shape: f32[8,20], index: 7, kind: output, shape index: {}]  }
   0x1   :  { %13 = vsyncpa [#allocation7], 0 }
   0x2   :  { %14 = vsyncpa [#allocation10], 0 }
   0x3   :  { %15 = vsyncpa [#allocation5], 0  ;;  %s829_s24 = smov [#allocation6]   ;;  %s711_s28 = scalar_lea.hbm %s957_s1, 1024 }
   0x4   :  { %s31_s25 = sshll.u32 %s829_s24, 4  ;;  %p712_p0 = scmp.ne.s32.totalorder %s957_s1, %s711_s28  ;;  %s32_s25 = int_to_ptr.vmem [resolvable:$true] %s31_s25 }
   0x5   :  { %p715_p1 = scmp.lt.u32.totalorder %s711_s28, %s957_s1 }
   0x7   :  { %p717_p2 = pnand %p715_p1, %p712_p0 }
   0x9   :  { %720 = shalt.err (!%p717_p2)
}
   0xa   :  { %s721_s10 = scalar_lea.vmem %s32_s25, 1024  ;;  %p726_p4 = scmp.lt.s32.totalorder %s32_s25, %s32_s25 }
   0xb   :  { %p722_p3 = scmp.ne.s32.totalorder %s32_s25, %s721_s10  ;;  %p727_p5 = scmp.lt.s32.totalorder %s721_s10, %s721_s10 }
   0xd   :  { %p728_p6 = por %p727_p5, %p726_p4 }
   0xf   :  { %p729_p7 = pnand %p728_p6, %p722_p3 }
  0x11   :  { %732 = shalt.err (!%p729_p7)
}
  0x12   :  { %s830_s11 = smov 64   ;;  %s831_s12 = smov 4  }
  0x13   :  { %37 = dma.hbm_to_vmem [thread:$0]  %s957_s1, 1024, %s32_s25, [#allocation7], %s830_s11, %s830_s11, %s831_s12  }
  0x14   :  { %s832_s15 = smov [#allocation3]   ;;  %s833_s17 = smov [#allocation8]  }
  0x15   :  { %s22_s16 = sshll.u32 %s832_s15, 4  ;;  %s45_s18 = sshll.u32 %s833_s17, 4  ;;  %s23_s16 = int_to_ptr.vmem [resolvable:$true] %s22_s16  ;;  %s46_s18 = int_to_ptr.vmem [resolvable:$true] %s45_s18 }
  0x16   :  { %s733_s21 = scalar_lea.hbm %s956_s0, 128 }
  0x17   :  { %p734_p8 = scmp.ne.s32.totalorder %s956_s0, %s733_s21  ;;  %p737_p9 = scmp.lt.u32.totalorder %s733_s21, %s956_s0 }
  0x19   :  { %p739_p10 = pnand %p737_p9, %p734_p8 }
  0x1b   :  { %742 = shalt.err (!%p739_p10)
}
  0x1c   :  { %s743_s1 = scalar_lea.vmem %s23_s16, 128  ;;  %p748_p12 = scmp.lt.s32.totalorder %s23_s16, %s23_s16 }
  0x1d   :  { %p744_p11 = scmp.ne.s32.totalorder %s23_s16, %s743_s1  ;;  %p749_p13 = scmp.lt.s32.totalorder %s743_s1, %s743_s1 }
  0x1f   :  { %p750_p0 = por %p749_p13, %p748_p12 }
  0x21   :  { %p751_p1 = pnand %p750_p0, %p744_p11 }
  0x23   :  { %754 = shalt.err (!%p751_p1)
}
  0x24   :  { %25 = dma.hbm_to_vmem [thread:$0]  %s956_s0, 128, %s23_s16, [#allocation4]  }
  0x25   :  { %s755_s30 = scalar_lea.hbm %s959_s3, 2048 }
  0x26   :  { %p756_p2 = scmp.ne.s32.totalorder %s959_s3, %s755_s30  ;;  %p759_p3 = scmp.lt.u32.totalorder %s755_s30, %s959_s3 }
  0x28   :  { %p761_p4 = pnand %p759_p3, %p756_p2 }
  0x2a   :  { %764 = shalt.err (!%p761_p4)
}
  0x2b   :  { %s765_s14 = scalar_lea.vmem %s46_s18, 2048  ;;  %p770_p6 = scmp.lt.s32.totalorder %s46_s18, %s46_s18 }
  0x2c   :  { %p766_p5 = scmp.ne.s32.totalorder %s46_s18, %s765_s14  ;;  %p771_p7 = scmp.lt.s32.totalorder %s765_s14, %s765_s14 }
  0x2e   :  { %p772_p8 = por %p771_p7, %p770_p6 }
  0x30   :  { %p773_p9 = pnand %p772_p8, %p766_p5 }
  0x32   :  { %776 = shalt.err (!%p773_p9)
}
  0x33   :  { %s834_s0 = smov 128   ;;  %s835_s15 = smov 8  }
  0x34   :  { %51 = dma.hbm_to_vmem [thread:$0]  %s959_s3, 2048, %s46_s18, [#allocation7], %s834_s0, %s834_s0, %s835_s15  }
  0x35   :  { %s836_s19 = smov [#allocation9]   ;;  %s777_s23 = scalar_lea.hbm %s961_s5, 2048 }
  0x36   :  { %s59_s20 = sshll.u32 %s836_s19, 4  ;;  %p778_p10 = scmp.ne.s32.totalorder %s961_s5, %s777_s23  ;;  %s60_s20 = int_to_ptr.vmem [resolvable:$true] %s59_s20 }
  0x37   :  { %p781_p11 = scmp.lt.u32.totalorder %s777_s23, %s961_s5 }
  0x39   :  { %p783_p12 = pnand %p781_p11, %p778_p10 }
  0x3b   :  { %786 = shalt.err (!%p783_p12)
}
  0x3c   :  { %s787_s27 = scalar_lea.vmem %s60_s20, 2048  ;;  %p792_p0 = scmp.lt.s32.totalorder %s60_s20, %s60_s20 }
  0x3d   :  { %p788_p13 = scmp.ne.s32.totalorder %s60_s20, %s787_s27  ;;  %p793_p1 = scmp.lt.s32.totalorder %s787_s27, %s787_s27 }
  0x3f   :  { %p794_p2 = por %p793_p1, %p792_p0 }
  0x41   :  { %p795_p3 = pnand %p794_p2, %p788_p13 }
  0x43   :  { %798 = shalt.err (!%p795_p3)
}
  0x44   :  { %65 = dma.hbm_to_vmem [thread:$0]  %s961_s5, 2048, %s60_s20, [#allocation10], %s830_s11, %s830_s11, %s831_s12  }
  0x45   :  { %821 = dma.done.wait [#allocation4], 128  }
  0x46   :  { %822 = vsyncadd [#allocation4], 4294967168 }
  0x47   :  { %823 = dma.done.wait [#allocation7], 3072  }
  0x48   :  { %824 = vsyncadd [#allocation7], 4294964224 }
  0x49   :  { %825 = dma.done.wait [#allocation10], 2048  }
  0x4a   :  { %826 = vsyncadd [#allocation10], 4294965248  ;;  %v837_v0 = vmov 0.0   ;;  %vm838_vm0 = vmmov 0   ;;  %v659_v1 = vld [vmem:[#allocation6] sm:$0xff]   ;;  %v660_v2 = vld [vmem:[#allocation6 + $0x8] sm:$0xff]   ;;  %v218_v53 = vlaneseq }
  0x4b   :  { %627 = vmatprep.subr.bf16.mxu0 %v837_v0  ;;  %81 = vst [vmem:[#allocation2] sm:$0xff] %v837_v0  ;;  %643 = vmatprep.mubr.msk.bf16.mxu0 %vm838_vm0, %v837_v0  ;;  %v661_v3 = vld [vmem:[#allocation6 + $0x10] sm:$0xff]   ;;  %vm83_vm1 = vcmask 818176   ;;  %v82_v4 = vld [vmem:[#allocation3] sm:$0xff]  ;;  %v667_v5 = vld [vmem:[#allocation8 + $0x4] ss:$8 sps:$4 sm:$0xff]  }
  0x4c   :  { %628 = vmatpush3.bf16.msra.mxu0 %v659_v1  ;;  %84 = vst.msk [vmem:[#allocation2] sm:$0xff] %vm83_vm1, %v82_v4  ;;  %v669_v6 = vld [vmem:[#allocation8] ss:$8 sps:$4 sm:$0xff]   ;;  %v662_v7 = vld [vmem:[#allocation6 + $0x18] sm:$0xff]   ;;  %308 = vmatprep.subr.bf16.mxu1 %v667_v5  ;;  %v673_v10 = vld [vmem:[#allocation8 + $0x24] ss:$8 sps:$4 sm:$0xff]  }
  0x4d   :  { %629 = vmatprep.subr.bf16.mxu0 %v837_v0  ;;  %v670_v8 = vld [vmem:[#allocation8 + $0x14] ss:$8 sps:$4 sm:$0xff]   ;;  %309 = vmatpush1.bf16.msra.mxu1 %v669_v6  ;;  %v672_v9 = vld [vmem:[#allocation8 + $0x10] ss:$8 sps:$4 sm:$0xff]   ;;  %v663_v11 = vld [vmem:[#allocation6 + $0x20] sm:$0xff]   ;;  %v839_v28 = vmov 0  }
  0x4e   :  { %310 = vmatprep.subr.bf16.mxu1 %v670_v8  ;;  %v675_v12 = vld [vmem:[#allocation8 + $0x20] ss:$8 sps:$4 sm:$0xff]   ;;  %v676_v14 = vld [vmem:[#allocation8 + $0x34] ss:$8 sps:$4 sm:$0xff]   ;;  %v678_v15 = vld [vmem:[#allocation8 + $0x30] ss:$8 sps:$4 sm:$0xff]   ;;  %340 = vmatprep.mubr.bf16.mxu1 %v839_v28 }
  0x4f   :  { %v664_v13 = vld [vmem:[#allocation6 + $0x28] sm:$0xff]   ;;  %v665_v17 = vld [vmem:[#allocation6 + $0x30] sm:$0xff]   ;;  %v666_v20 = vld [vmem:[#allocation6 + $0x38] sm:$0xff]   ;;  %v219_v54 = vshrl.u32 %v218_v53, 7  ;;  %vm534_vm2 = vcmask 162816  }
  0x50   :  { %630 = vmatpush3.bf16.msra.mxu0 %v660_v2  ;;  %v679_v16 = vld [vmem:[#allocation8 + $0x44] ss:$8 sps:$4 sm:$0xff]   ;;  %v681_v18 = vld [vmem:[#allocation8 + $0x40] ss:$8 sps:$4 sm:$0xff]   ;;  %v682_v19 = vld [vmem:[#allocation8 + $0x54] ss:$8 sps:$4 sm:$0xff]  }
  0x51   :  { %631 = vmatprep.subr.bf16.mxu0 %v837_v0  ;;  %311 = vmatpush1.bf16.msra.mxu1 %v672_v9  ;;  %v684_v22 = vld [vmem:[#allocation8 + $0x50] ss:$8 sps:$4 sm:$0xff]   ;;  %v685_v24 = vld [vmem:[#allocation8 + $0x64] ss:$8 sps:$4 sm:$0xff]   ;;  %v687_v25 = vld [vmem:[#allocation8 + $0x60] ss:$8 sps:$4 sm:$0xff]  }
  0x52   :  { %312 = vmatprep.subr.bf16.mxu1 %v673_v10  ;;  %v688_v26 = vld [vmem:[#allocation8 + $0x74] ss:$8 sps:$4 sm:$0xff]   ;;  %v690_v27 = vld [vmem:[#allocation8 + $0x70] ss:$8 sps:$4 sm:$0xff]   ;;  %v691_v29 = vld [vmem:[#allocation9 + $0x40] sm:$0xff]   ;;  %v220_v55 = vsub.s32 0, %v219_v54 }
  0x53   :  { %v85_v21 = vld [vmem:[#allocation2] sm:$0xff]  ;;  %v692_v30 = vld [vmem:[#allocation9] sm:$0xff]   ;;  %v693_v31 = vld [vmem:[#allocation9 + $0x48] sm:$0xff]   ;;  %v224_v57 = vsub.s32 1, %v219_v54 }
  0x54   :  { %632 = vmatpush3.bf16.msra.mxu0 %v661_v3  ;;  %v86_v23 = vpack.c.bf16 %v85_v21, %v85_v21  ;;  %v694_v32 = vld [vmem:[#allocation9 + $0x8] sm:$0xff]   ;;  %v695_v33 = vld [vmem:[#allocation9 + $0x50] sm:$0xff]   ;;  %v697_v35 = vld [vmem:[#allocation9 + $0x58] sm:$0xff]  }
  0x55   :  { %633 = vmatprep.subr.bf16.mxu0 %v837_v0  ;;  %313 = vmatpush1.bf16.msra.mxu1 %v675_v12  ;;  %v696_v34 = vld [vmem:[#allocation9 + $0x10] sm:$0xff]   ;;  %v698_v36 = vld [vmem:[#allocation9 + $0x18] sm:$0xff]   ;;  %v699_v37 = vld [vmem:[#allocation9 + $0x60] sm:$0xff]  }
  0x56   :  { %314 = vmatprep.subr.bf16.mxu1 %v676_v14  ;;  %v700_v38 = vld [vmem:[#allocation9 + $0x20] sm:$0xff]   ;;  %v701_v39 = vld [vmem:[#allocation9 + $0x68] sm:$0xff]   ;;  %v553_v41 = vld [vmem:[%s958_s2] ss:$0 sm:$0xff] }
  0x57   :  { %v702_v40 = vld [vmem:[#allocation9 + $0x28] sm:$0xff]   ;;  %v703_v49 = vld [vmem:[#allocation9 + $0x70] sm:$0xff]   ;;  %v705_v51 = vld [vmem:[#allocation9 + $0x78] sm:$0xff]  }
  0x58   :  { %634 = vmatpush3.bf16.msra.mxu0 %v662_v7  ;;  %v704_v50 = vld [vmem:[#allocation9 + $0x30] sm:$0xff]   ;;  %v706_v52 = vld [vmem:[#allocation9 + $0x38] sm:$0xff]  }
  0x59   :  { %635 = vmatprep.subr.bf16.mxu0 %v837_v0  ;;  %315 = vmatpush1.bf16.msra.mxu1 %v678_v15  ;;  %v216_v56 = vld [vmem:[%s960_s4] sm:$0x3]  ;;  %s840_s4 = smov [#allocation11]  }
  0x5a   :  { %316 = vmatprep.subr.bf16.mxu1 %v679_v16  ;;  %v221_v58 = vrot.slane %v216_v56, %v220_v55  ;;  %v225_v59 = vrot.slane %v216_v56, %v224_v57  ;;  %v578_v7 = vld [vmem:[%s962_s6] ss:$0 sm:$0xff]  ;;  %s542_s30 = sshll.u32 %s840_s4, 4  ;;  %s543_s30 = int_to_ptr.vmem [resolvable:$true] %s542_s30 }
  0x5b   :  { %s799_s8 = scalar_lea.vmem %s543_s30, 128  ;;  %p804_p5 = scmp.lt.s32.totalorder %s543_s30, %s543_s30 }
  0x5c   :  { %636 = vmatpush3.bf16.msra.mxu0 %v663_v11  ;;  %p800_p4 = scmp.ne.s32.totalorder %s543_s30, %s799_s8  ;;  %p805_p6 = scmp.lt.s32.totalorder %s799_s8, %s799_s8 }
  0x5d   :  { %637 = vmatprep.subr.bf16.mxu0 %v837_v0  ;;  %317 = vmatpush1.bf16.msra.mxu1 %v681_v18 }
  0x5e   :  { %318 = vmatprep.subr.bf16.mxu1 %v682_v19  ;;  %p806_p7 = por %p805_p6, %p804_p5 }
  0x60   :  { %638 = vmatpush3.bf16.msra.mxu0 %v664_v13  ;;  %p807_p8 = pnand %p806_p7, %p800_p4 }
  0x61   :  { %639 = vmatprep.subr.bf16.mxu0 %v837_v0  ;;  %319 = vmatpush1.bf16.msra.mxu1 %v684_v22 }
  0x62   :  { %320 = vmatprep.subr.bf16.mxu1 %v685_v24 }
  0x64   :  { %640 = vmatpush3.bf16.msra.mxu0 %v665_v17 }
  0x65   :  { %641 = vmatprep.subr.bf16.mxu0 %v837_v0  ;;  %321 = vmatpush1.bf16.msra.mxu1 %v687_v25 }
  0x66   :  { %322 = vmatprep.subr.bf16.mxu1 %v688_v26 }
  0x68   :  { %642 = vmatpush3.bf16.msra.mxu0 %v666_v20 }
  0x69   :  { %323 = vmatpush1.bf16.msra.mxu1 %v690_v27  ;;  %605 = vmatprep.subr.bf16.mxu0 %v691_v29 }
  0x6b   :  { %644 = vmatmul.mubr.bf16.vlgmr.msra.gmra.mrb[0].mxu0 %v86_v23 }
  0x6c   :  { %606 = vmatpush3.bf16.msra.mxu0 %v692_v30 }
  0x6d   :  { %607 = vmatprep.subr.bf16.mxu0 %v693_v31 }
  0x70   :  { %608 = vmatpush3.bf16.msra.mxu0 %v694_v32 }
  0x71   :  { %609 = vmatprep.subr.bf16.mxu0 %v695_v33 }
  0x74   :  { %610 = vmatpush3.bf16.msra.mxu0 %v696_v34 }
  0x75   :  { %611 = vmatprep.subr.bf16.mxu0 %v697_v35 }
  0x78   :  { %612 = vmatpush3.bf16.msra.mxu0 %v698_v36 }
  0x79   :  { %613 = vmatprep.subr.bf16.mxu0 %v699_v37 }
  0x7c   :  { %614 = vmatpush3.bf16.msra.mxu0 %v700_v38 }
  0x7d   :  { %615 = vmatprep.subr.bf16.mxu0 %v701_v39 }
  0x80   :  { %616 = vmatpush3.bf16.msra.mxu0 %v702_v40 }
  0x81   :  { %617 = vmatprep.subr.bf16.mxu0 %v703_v49 }
  0x84   :  { %618 = vmatpush3.bf16.msra.mxu0 %v704_v50 }
  0x85   :  { %619 = vmatprep.subr.bf16.mxu0 %v705_v51 }
  0x88   :  { %620 = vmatpush3.bf16.msra.mxu0 %v706_v52 }
 0x13e   :  { %v192_v42 = vpop.f32.mrb[0].mxu0 }
 0x13f   :  { %v193_v43 = vadd.f32 %v553_v41, %v192_v42  ;;  %v645_v44 = vpop.f32.mrb[1].mxu0 }
 0x140   :  { %v195_v45 = vpop.f32.mrb[2].mxu0 }
 0x141   :  { %v198_v46 = vmax.f32 %v193_v43, 0.0  ;;  %v646_v47 = vpop.f32.mrb[3].mxu0 }
 0x143   :  { %v199_v48 = vpack.c.bf16 %v198_v46, %v198_v46 }
 0x145   :  { %341 = vmatmul.mubr.bf16.vlgmr.msra.gmra.mrb[0].mxu1 %v199_v48 }
 0x218   :  { %v342_v60 = vpop.f32.mrb[0].mxu1 }
 0x219   :  { %v343_v61 = vadd.f32 %v342_v60, %v221_v58  ;;  %v344_v62 = vpop.f32.mrb[1].mxu1 }
 0x21a   :  { %v345_v63 = vadd.f32 %v344_v62, %v225_v59  ;;  %v346_v0 = vpop.f32.mrb[2].mxu1 }
 0x21b   :  { %v349_v1 = vmax.f32 %v343_v61, 0.0  ;;  %v347_v2 = vpop.f32.mrb[3].mxu1 }
 0x21c   :  { %v350_v3 = vmax.f32 %v345_v63, 0.0 }
 0x21d   :  { %v351_v5 = vpack.c.bf16 %v349_v1, %v349_v1 }
 0x21e   :  { %v352_v4 = vpack.c.bf16 %v350_v3, %v350_v3 }
 0x220   :  { %520 = vmatprep.mubr.bf16.mxu0 %v352_v4 }
 0x221   :  { %521 = vmatmul.mubr.bf16.vlgmr.msra.gmra.mrb[4].mxu0 %v351_v5 }
 0x2f4   :  { %v621_v6 = vpop.f32.mrb[4].mxu0 }
 0x2f5   :  { %v622_v8 = vpop.f32.mrb[5].mxu0 }
 0x2f6   :  { %v623_v9 = vadd.f32 %v622_v8, %v621_v6  ;;  %v624_v10 = vpop.f32.mrb[6].mxu0 }
 0x2f7   :  { %v625_v11 = vpop.f32.mrb[7].mxu0 }
 0x2f8   :  { %v523_v12 = vadd.f32 %v623_v9, %v578_v7 }
 0x2fa   :  { %v595_v13 = vmul.f32 -1.442695, %v523_v12 }
 0x2fc   :  { %707 = vpow2.f32 %v595_v13 }
 0x306   :  { %v708_v14 = vpop.eup %707 }
 0x307   :  { %v531_v15 = vadd.f32 1.0, %v708_v14 }
 0x309   :  { %709 = vrcp.f32 %v531_v15 }
 0x313   :  { %v710_v16 = vpop.eup %709 }
 0x314   :  { %535 = vst.msk [vmem:[#allocation11] sm:$0xff] %vm534_vm2, %v710_v16 }
 0x315   :  { %810 = shalt.err (!%p807_p8)
}
 0x316   :  { %s811_s10 = scalar_lea.hbm %s963_s7, 128 }
 0x317   :  { %p812_p9 = scmp.ne.s32.totalorder %s963_s7, %s811_s10  ;;  %p815_p10 = scmp.lt.u32.totalorder %s811_s10, %s963_s7 }
 0x319   :  { %p817_p11 = pnand %p815_p10, %p812_p9 }
 0x31b   :  { %820 = shalt.err (!%p817_p11)
}
 0x31c   :  { %545 = dma.vmem_to_hbm [thread:$0]  %s543_s30, 128, %s963_s7, [#allocation5]  }
 0x31d   :  { %827 = dma.done.wait [#allocation5], 128  }
 0x31e   :  { %828 = vsyncadd [#allocation5], 4294967168 }
 0x31f   :  { %549 = vsyncpa [#allocation4], 1 }
 0x320   :  { %550 = vsyncpa [#allocation7], 1 }
 0x321   :  { %551 = vsyncpa [#allocation10], 1 }
 0x322   :  { %552 = vsyncpa [#allocation5], 1 }

</bundles_post_ra>
